<compile_context>
chip_gen: v7x
topology: tpu7x:2x2x1
jax: 0.10.0
libtpu: 0.0.40
codegen_flags: <defaults>
</compile_context>

<pallas_src>
import jax
import jax.numpy as jnp
from jax.experimental import pallas as pl
from jax.experimental.pallas import tpu as pltpu

_LANE = 128      # last-dim (lane) alignment
_SUBLANE = 8     # second-to-last-dim (sublane) alignment


def _round_up(n, m):
    return ((n + m - 1) // m) * m


def _make_fused_mlp_kernel(num_layers):
    """Builds a kernel: refs = (x, w_0..w_{L-1}, b_0..b_{L-1}, out)."""

    def kernel(*refs):
        x_ref = refs[0]
        w_refs = refs[1:1 + num_layers]
        b_refs = refs[1 + num_layers:1 + 2 * num_layers]
        o_ref = refs[1 + 2 * num_layers]

        x = x_ref[...]                              # (B_pad, D0_pad) f32
        for li in range(num_layers):                # static unrolled layer loop
            w = w_refs[li][...]                     # (Din_pad, Dout_pad), pre-transposed
            b = b_refs[li][...]                     # (1, Dout_pad), broadcast once
            y = jnp.dot(x, w, preferred_element_type=jnp.float32)   # MXU
            x = jnp.tanh(y + b)                     # VPU add + EUP tanh
        o_ref[...] = x.astype(o_ref.dtype)

    return kernel


def _fused_mlp(x_pad, weights_pad, biases_pad):
    """One fused pallas_call for the whole (padded) MLP."""
    num_layers = len(weights_pad)
    b_pad = x_pad.shape[0]
    out_pad = weights_pad[-1].shape[1]
    return pl.pallas_call(
        _make_fused_mlp_kernel(num_layers),
        out_shape=jax.ShapeDtypeStruct((b_pad, out_pad), jnp.float32),
        in_specs=[pl.BlockSpec(memory_space=pltpu.VMEM)] * (1 + 2 * num_layers),
        out_specs=pl.BlockSpec(memory_space=pltpu.VMEM),
    )(x_pad, *weights_pad, *biases_pad)


class Net:
    """JAX/Pallas mirror of the PyTorch Net(shape) module's forward pass."""

    def __init__(self, shape, key):
        self.shape = tuple(shape)
        self.num_layers = len(shape) - 1

        # Raw (PyTorch-layout) params, kept only for the pure-JAX reference.
        self.weights = []            # (out, in)
        self.biases = []             # (out,)
        # Padded, pre-transposed params actually fed to the fused kernel.
        self.weights_pad = []        # (in_pad, out_pad)
        self.biases_pad = []         # (1, out_pad)

        for i in range(self.num_layers):
            key, wk, bk = jax.random.split(key, 3)
            fan_in, fan_out = shape[i], shape[i + 1]
            # layer.weight.data.normal_(0, 0.1)  (PyTorch layout: (out, in))
            w = 0.1 * jax.random.normal(wk, (fan_out, fan_in), dtype=jnp.float32)
            # PyTorch Linear default bias init: U(-1/sqrt(in), 1/sqrt(in))
            bound = 1.0 / (fan_in ** 0.5)
            b = jax.random.uniform(
                bk, (fan_out,), dtype=jnp.float32, minval=-bound, maxval=bound
            )
            self.weights.append(w)
            self.biases.append(b)

            in_pad = _round_up(fan_in, _LANE)
            out_pad = _round_up(fan_out, _LANE)
            w_t = jnp.zeros((in_pad, out_pad), jnp.float32)
            w_t = w_t.at[:fan_in, :fan_out].set(w.T)          # (in, out), zero-padded
            b_p = jnp.zeros((1, out_pad), jnp.float32)
            b_p = b_p.at[0, :fan_out].set(b)
            self.weights_pad.append(w_t)
            self.biases_pad.append(b_p)

        # Single jitted forward: pad -> one fused pallas_call -> slice.
        self._jit_forward = jax.jit(self._forward_impl)

    def _forward_impl(self, x):
        batch, in_features = x.shape
        b_pad = _round_up(batch, _SUBLANE)
        in_pad = self.weights_pad[0].shape[0]
        x_pad = jnp.zeros((b_pad, in_pad), jnp.float32)
        x_pad = x_pad.at[:batch, :in_features].set(x.astype(jnp.float32))
        y_pad = _fused_mlp(x_pad, self.weights_pad, self.biases_pad)
        return y_pad[:batch, : self.shape[-1]]

    def forward(self, inputs):
        # for each layer: inputs = tanh(Linear(inputs))  (fused into one kernel)
        return self._jit_forward(inputs)

    def reference(self, inputs):
        """Pure-JAX reference of the PyTorch forward, for validation."""
        x = inputs.astype(jnp.float32)
        for w, b in zip(self.weights, self.biases):
            x = jnp.tanh(x @ w.T + b[None, :])
        return x

    # TODO(synk): learn() (MSELoss + Adam training loop) is optimizer logic,
    # not a forward-pass kernel; only forward() is implemented here.


if __name__ == "__main__":
    key = jax.random.PRNGKey(0)
    k_param, k_x = jax.random.split(key)

    # Small MLP consistent with Net(shape): shape = [in, hidden..., out]
    shape = (4, 32, 16, 1)
    batch = 8

    net = Net(shape, k_param)
    x = jax.random.normal(k_x, (batch, shape[0]), dtype=jnp.float32)

    y = net.forward(x)
    y = jax.block_until_ready(y)

    assert y.shape == (batch, shape[-1])
    assert y.dtype == jnp.float32
    # tanh output must be bounded
    assert bool(jnp.all(jnp.abs(y) <= 1.0))
    # match the pure-JAX (PyTorch-equivalent) forward
    y_ref = net.reference(x)
    assert bool(jnp.allclose(y, y_ref, atol=1e-5, rtol=1e-5))

    print("KERNEL_OK")
</pallas_src>

<mosaic_0001>
module attributes {stable_mosaic.version = 11 : i64} {
  func.func @kernel(%arg0: memref<8x128xf32, #tpu.memory_space<vmem>>, %arg1: memref<128x128xf32, #tpu.memory_space<vmem>>, %arg2: memref<128x128xf32, #tpu.memory_space<vmem>>, %arg3: memref<128x128xf32, #tpu.memory_space<vmem>>, %arg4: memref<1x128xf32, #tpu.memory_space<vmem>>, %arg5: memref<1x128xf32, #tpu.memory_space<vmem>>, %arg6: memref<1x128xf32, #tpu.memory_space<vmem>>, %arg7: memref<8x128xf32, #tpu.memory_space<vmem>>) attributes {dimension_semantics = [], scalar_prefetch = 0 : i64, scratch_operands = 0 : i64, tpu.core_type = #tpu.core_type<tc>} {
    %c0 = arith.constant 0 : index
    %c0_0 = arith.constant 0 : index
    %0 = vector.load %arg0[%c0, %c0_0] : memref<8x128xf32, #tpu.memory_space<vmem>>, vector<8x128xf32>
    %c0_1 = arith.constant 0 : index
    %c0_2 = arith.constant 0 : index
    %1 = vector.load %arg1[%c0_1, %c0_2] : memref<128x128xf32, #tpu.memory_space<vmem>>, vector<128x128xf32>
    %c0_3 = arith.constant 0 : index
    %c0_4 = arith.constant 0 : index
    %2 = vector.load %arg4[%c0_3, %c0_4] : memref<1x128xf32, #tpu.memory_space<vmem>>, vector<1x128xf32>
    %cst = arith.constant dense<0.000000e+00> : vector<8x128xf32>
    %3 = tpu.matmul %0, %1, %cst {dimension_numbers = #tpu.dot_dimension_numbers<[1], [0], [0], [1], [0, 0, 1, 1], [], []>} : vector<8x128xf32>, vector<128x128xf32>, vector<8x128xf32> -> vector<8x128xf32>
    %4 = vector.broadcast %2 : vector<1x128xf32> to vector<8x128xf32>
    %5 = arith.addf %3, %4 : vector<8x128xf32>
    %6 = math.tanh %5 : vector<8x128xf32>
    %c0_5 = arith.constant 0 : index
    %c0_6 = arith.constant 0 : index
    %7 = vector.load %arg2[%c0_5, %c0_6] : memref<128x128xf32, #tpu.memory_space<vmem>>, vector<128x128xf32>
    %c0_7 = arith.constant 0 : index
    %c0_8 = arith.constant 0 : index
    %8 = vector.load %arg5[%c0_7, %c0_8] : memref<1x128xf32, #tpu.memory_space<vmem>>, vector<1x128xf32>
    %cst_9 = arith.constant dense<0.000000e+00> : vector<8x128xf32>
    %9 = tpu.matmul %6, %7, %cst_9 {dimension_numbers = #tpu.dot_dimension_numbers<[1], [0], [0], [1], [0, 0, 1, 1], [], []>} : vector<8x128xf32>, vector<128x128xf32>, vector<8x128xf32> -> vector<8x128xf32>
    %10 = vector.broadcast %8 : vector<1x128xf32> to vector<8x128xf32>
    %11 = arith.addf %9, %10 : vector<8x128xf32>
    %12 = math.tanh %11 : vector<8x128xf32>
    %c0_10 = arith.constant 0 : index
    %c0_11 = arith.constant 0 : index
    %13 = vector.load %arg3[%c0_10, %c0_11] : memref<128x128xf32, #tpu.memory_space<vmem>>, vector<128x128xf32>
    %c0_12 = arith.constant 0 : index
    %c0_13 = arith.constant 0 : index
    %14 = vector.load %arg6[%c0_12, %c0_13] : memref<1x128xf32, #tpu.memory_space<vmem>>, vector<1x128xf32>
    %cst_14 = arith.constant dense<0.000000e+00> : vector<8x128xf32>
    %15 = tpu.matmul %12, %13, %cst_14 {dimension_numbers = #tpu.dot_dimension_numbers<[1], [0], [0], [1], [0, 0, 1, 1], [], []>} : vector<8x128xf32>, vector<128x128xf32>, vector<8x128xf32> -> vector<8x128xf32>
    %16 = vector.broadcast %14 : vector<1x128xf32> to vector<8x128xf32>
    %17 = arith.addf %15, %16 : vector<8x128xf32>
    %18 = math.tanh %17 : vector<8x128xf32>
    %c0_15 = arith.constant 0 : index
    %c0_16 = arith.constant 0 : index
    %19 = vector.load %arg7[%c0_15, %c0_16] : memref<8x128xf32, #tpu.memory_space<vmem>>, vector<8x128xf32>
    tpu.vector_store %arg7[%c0_15, %c0_16], %18 {strides = array<i32>} : memref<8x128xf32, #tpu.memory_space<vmem>>, vector<8x128xf32>,
    return
  }
}

</mosaic_0001>

<bundles_post_ra>
// kernel: _forward_impl.1
= control target key start
LH: loop header
LB: loop body
LE: loop exit
PB: predicated region body
PF: predicated region fallthrough
CT: control target
= control target key end

     0   :  { %12 = vsyncpa [#allocation3], 0  ;;  %s817_s0 = inlined_call_operand.vmem [shape: f32[8,128], index: 0, kind: input, shape index: {}]   ;;  %s818_s1 = inlined_call_operand.hbm [shape: f32[128,128], index: 1, kind: input, shape index: {}]   ;;  %s819_s2 = inlined_call_operand.hbm [shape: f32[128,128], index: 2, kind: input, shape index: {}]   ;;  %s820_s3 = inlined_call_operand.hbm [shape: f32[128,128], index: 3, kind: input, shape index: {}]   ;;  %s821_s4 = inlined_call_operand.vmem [shape: f32[1,128], index: 4, kind: input, shape index: {}]   ;;  %s822_s5 = inlined_call_operand.vmem [shape: f32[1,128], index: 5, kind: input, shape index: {}]   ;;  %s823_s6 = inlined_call_operand.vmem [shape: f32[1,128], index: 6, kind: input, shape index: {}]   ;;  %s824_s7 = inlined_call_operand.vmem [shape: f32[8,128], index: 7, kind: output, shape index: {}]  }
   0x1   :  { %13 = vsyncpa [#allocation5], 0  ;;  %s672_s24 = smov [#allocation4]   ;;  %s673_s26 = smov [#allocation2]  }
   0x2   :  { %s33_s25 = sshll.u32 %s672_s24, 4  ;;  %s21_s27 = sshll.u32 %s673_s26, 4  ;;  %s34_s25 = int_to_ptr.vmem [resolvable:$true] %s33_s25  ;;  %s720_s27 = int_to_ptr.vmem [resolvable:$true] %s21_s27 }
   0x3   :  { %s602_s30 = scalar_lea.hbm %s819_s2, 2048 }
   0x4   :  { %p603_p0 = scmp.ne.s32.totalorder %s819_s2, %s602_s30  ;;  %p606_p1 = scmp.lt.u32.totalorder %s602_s30, %s819_s2 }
   0x6   :  { %p608_p2 = pnand %p606_p1, %p603_p0 }
   0x8   :  { %611 = shalt.err (!%p608_p2)
}
   0x9   :  { %s612_s12 = scalar_lea.vmem %s34_s25, 2048  ;;  %p617_p4 = scmp.lt.s32.totalorder %s34_s25, %s34_s25 }
   0xa   :  { %p613_p3 = scmp.ne.s32.totalorder %s34_s25, %s612_s12  ;;  %p618_p5 = scmp.lt.s32.totalorder %s612_s12, %s612_s12 }
   0xc   :  { %p619_p6 = por %p618_p5, %p617_p4 }
   0xe   :  { %p620_p7 = pnand %p619_p6, %p613_p3 }
  0x10   :  { %623 = shalt.err (!%p620_p7)
}
  0x11   :  { %s674_s13 = smov 128   ;;  %s675_s14 = smov 8  }
  0x12   :  { %39 = dma.hbm_to_vmem [thread:$0]  %s819_s2, 2048, %s34_s25, [#allocation5], %s674_s13, %s674_s13, %s675_s14  }
  0x13   :  { %s624_s19 = scalar_lea.hbm %s818_s1, 2048 }
  0x14   :  { %p625_p8 = scmp.ne.s32.totalorder %s818_s1, %s624_s19  ;;  %p628_p9 = scmp.lt.u32.totalorder %s624_s19, %s818_s1 }
  0x16   :  { %p630_p10 = pnand %p628_p9, %p625_p8 }
  0x18   :  { %633 = shalt.err (!%p630_p10)
}
  0x19   :  { %s634_s24 = scalar_lea.vmem %s720_s27, 2048  ;;  %p639_p12 = scmp.lt.s32.totalorder %s720_s27, %s720_s27 }
  0x1a   :  { %p635_p11 = scmp.ne.s32.totalorder %s720_s27, %s634_s24  ;;  %p640_p13 = scmp.lt.s32.totalorder %s634_s24, %s634_s24 }
  0x1c   :  { %p641_p0 = por %p640_p13, %p639_p12 }
  0x1e   :  { %p642_p1 = pnand %p641_p0, %p635_p11 }
  0x20   :  { %645 = shalt.err (!%p642_p1)
}
  0x21   :  { %27 = dma.hbm_to_vmem [thread:$0]  %s818_s1, 2048, %s720_s27, [#allocation3], %s674_s13, %s674_s13, %s675_s14  }
  0x22   :  { %s676_s26 = smov [#allocation6]   ;;  %s646_s8 = scalar_lea.hbm %s820_s3, 2048 }
  0x23   :  { %s45_s28 = sshll.u32 %s676_s26, 4  ;;  %p647_p2 = scmp.ne.s32.totalorder %s820_s3, %s646_s8  ;;  %s46_s28 = int_to_ptr.vmem [resolvable:$true] %s45_s28 }
  0x24   :  { %p650_p3 = scmp.lt.u32.totalorder %s646_s8, %s820_s3 }
  0x26   :  { %p652_p4 = pnand %p650_p3, %p647_p2 }
  0x28   :  { %655 = shalt.err (!%p652_p4)
}
  0x29   :  { %s656_s15 = scalar_lea.vmem %s46_s28, 2048  ;;  %p661_p6 = scmp.lt.s32.totalorder %s46_s28, %s46_s28 }
  0x2a   :  { %p657_p5 = scmp.ne.s32.totalorder %s46_s28, %s656_s15  ;;  %p662_p7 = scmp.lt.s32.totalorder %s656_s15, %s656_s15 }
  0x2c   :  { %p663_p8 = por %p662_p7, %p661_p6 }
  0x2e   :  { %p664_p9 = pnand %p663_p8, %p657_p5 }
  0x30   :  { %667 = shalt.err (!%p664_p9)
}
  0x31   :  { %51 = dma.hbm_to_vmem [thread:$0]  %s820_s3, 2048, %s46_s28, [#allocation5], %s674_s13, %s674_s13, %s675_s14  }
  0x32   :  { %668 = dma.done.wait [#allocation3], 2048  }
  0x33   :  { %669 = vsyncadd [#allocation3], 4294965248 }
  0x34   :  { %670 = dma.done.wait [#allocation5], 4096  }
  0x35   :  { %671 = vsyncadd [#allocation5], 4294963200  ;;  %v677_v0 = vmov 0.0|0.0   ;;  %vm678_vm0 = vmmov 0   ;;  %v679_v1 = vmov 0.0   ;;  %v68_v2 = vld [vmem:[#allocation2] sm:$0xff] }
  0x36   :  { %516 = vmatprep.subr.bf16.mxu0 %v677_v0  ;;  %443 = vmatprep.mubr.msk.f32.mxu0 %vm678_vm0, %v679_v1  ;;  %v69_v3 = vld [vmem:[#allocation2 + $0x8] sm:$0xff]  ;;  %v70_v4 = vld [vmem:[#allocation2 + $0x10] sm:$0xff]  ;;  %v71_v6 = vld [vmem:[#allocation2 + $0x18] sm:$0xff] }
  0x37   :  { %540 = vmatprep.subr.bf16.mxu1 %v677_v0  ;;  %478 = vmatprep.mubr.msk.f32.mxu1 %vm678_vm0, %v679_v1  ;;  %v517_v5 = vpack.c.bf16 %v69_v3, %v68_v2  ;;  %v520_v7 = vpack.c.bf16 %v71_v6, %v70_v4  ;;  %v72_v8 = vld [vmem:[#allocation2 + $0x20] sm:$0xff]  ;;  %v73_v9 = vld [vmem:[#allocation2 + $0x28] sm:$0xff]  ;;  %v164_v12 = vld [vmem:[#allocation4 + $0x10] sm:$0xff] }
  0x38   :  { %v162_v10 = vld [vmem:[#allocation4] sm:$0xff]  ;;  %v163_v11 = vld [vmem:[#allocation4 + $0x8] sm:$0xff]  ;;  %v165_v13 = vld [vmem:[#allocation4 + $0x18] sm:$0xff]  ;;  %v523_v14 = vpack.c.bf16 %v73_v9, %v72_v8 }
  0x39   :  { %518 = vmatpush3.bf16.msra.mxu0 %v517_v5  ;;  %v541_v15 = vpack.c.bf16 %v163_v11, %v162_v10  ;;  %v74_v16 = vld [vmem:[#allocation2 + $0x30] sm:$0xff]  ;;  %v75_v17 = vld [vmem:[#allocation2 + $0x38] sm:$0xff]  ;;  %v544_v18 = vpack.c.bf16 %v165_v13, %v164_v12  ;;  %v166_v19 = vld [vmem:[#allocation4 + $0x20] sm:$0xff] }
  0x3a   :  { %519 = vmatprep.subr.bf16.mxu0 %v677_v0  ;;  %v167_v20 = vld [vmem:[#allocation4 + $0x28] sm:$0xff]  ;;  %v526_v21 = vpack.c.bf16 %v75_v17, %v74_v16  ;;  %v76_v22 = vld [vmem:[#allocation2 + $0x40] sm:$0xff]  ;;  %v168_v25 = vld [vmem:[#allocation4 + $0x30] sm:$0xff] }
  0x3b   :  { %542 = vmatpush3.bf16.msra.mxu1 %v541_v15  ;;  %v77_v23 = vld [vmem:[#allocation2 + $0x48] sm:$0xff]  ;;  %v547_v24 = vpack.c.bf16 %v167_v20, %v166_v19  ;;  %v169_v26 = vld [vmem:[#allocation4 + $0x38] sm:$0xff]  ;;  %v78_v28 = vld [vmem:[#allocation2 + $0x50] sm:$0xff] }
  0x3c   :  { %543 = vmatprep.subr.bf16.mxu1 %v677_v0  ;;  %v529_v27 = vpack.c.bf16 %v77_v23, %v76_v22  ;;  %v79_v29 = vld [vmem:[#allocation2 + $0x58] sm:$0xff]  ;;  %v550_v30 = vpack.c.bf16 %v169_v26, %v168_v25  ;;  %v170_v31 = vld [vmem:[#allocation4 + $0x40] sm:$0xff]  ;;  %v171_v32 = vld [vmem:[#allocation4 + $0x48] sm:$0xff] }
  0x3d   :  { %521 = vmatpush3.bf16.msra.mxu0 %v520_v7  ;;  %v532_v33 = vpack.c.bf16 %v79_v29, %v78_v28  ;;  %v80_v34 = vld [vmem:[#allocation2 + $0x60] sm:$0xff]  ;;  %v81_v35 = vld [vmem:[#allocation2 + $0x68] sm:$0xff]  ;;  %v553_v36 = vpack.c.bf16 %v171_v32, %v170_v31  ;;  %v82_v38 = vld [vmem:[#allocation2 + $0x70] sm:$0xff] }
  0x3e   :  { %522 = vmatprep.subr.bf16.mxu0 %v677_v0  ;;  %v535_v37 = vpack.c.bf16 %v81_v35, %v80_v34  ;;  %v83_v39 = vld [vmem:[#allocation2 + $0x78] sm:$0xff]  ;;  %v67_v41 = vld [vmem:[%s817_s0] sm:$0xff]  ;;  %v172_v42 = vld [vmem:[#allocation4 + $0x50] sm:$0xff] }
  0x3f   :  { %545 = vmatpush3.bf16.msra.mxu1 %v544_v18  ;;  %v538_v40 = vpack.c.bf16 %v83_v39, %v82_v38  ;;  %v173_v43 = vld [vmem:[#allocation4 + $0x58] sm:$0xff]  ;;  %v174_v45 = vld [vmem:[#allocation4 + $0x60] sm:$0xff]  ;;  %v175_v46 = vld [vmem:[#allocation4 + $0x68] sm:$0xff] }
  0x40   :  { %546 = vmatprep.subr.bf16.mxu1 %v677_v0  ;;  %v556_v44 = vpack.c.bf16 %v173_v43, %v172_v42  ;;  %v559_v47 = vpack.c.bf16 %v175_v46, %v174_v45  ;;  %v176_v48 = vld [vmem:[#allocation4 + $0x70] sm:$0xff]  ;;  %v177_v49 = vld [vmem:[#allocation4 + $0x78] sm:$0xff]  ;;  %v256_v51 = vld [vmem:[#allocation6] sm:$0xff] }
  0x41   :  { %524 = vmatpush3.bf16.msra.mxu0 %v523_v14  ;;  %v562_v50 = vpack.c.bf16 %v177_v49, %v176_v48  ;;  %v257_v52 = vld [vmem:[#allocation6 + $0x8] sm:$0xff]  ;;  %v258_v53 = vld [vmem:[#allocation6 + $0x10] sm:$0xff]  ;;  %v259_v55 = vld [vmem:[#allocation6 + $0x18] sm:$0xff] }
  0x42   :  { %525 = vmatprep.subr.bf16.mxu0 %v677_v0  ;;  %v565_v54 = vpack.c.bf16 %v257_v52, %v256_v51  ;;  %v568_v56 = vpack.c.bf16 %v259_v55, %v258_v53  ;;  %v260_v57 = vld [vmem:[#allocation6 + $0x20] sm:$0xff]  ;;  %v261_v58 = vld [vmem:[#allocation6 + $0x28] sm:$0xff]  ;;  %v262_v60 = vld [vmem:[#allocation6 + $0x30] sm:$0xff] }
  0x43   :  { %548 = vmatpush3.bf16.msra.mxu1 %v547_v24  ;;  %v571_v59 = vpack.c.bf16 %v261_v58, %v260_v57  ;;  %v263_v61 = vld [vmem:[#allocation6 + $0x38] sm:$0xff]  ;;  %v264_v63 = vld [vmem:[#allocation6 + $0x40] sm:$0xff]  ;;  %v266_v8 = vld [vmem:[#allocation6 + $0x50] sm:$0xff] }
  0x44   :  { %549 = vmatprep.subr.bf16.mxu1 %v677_v0  ;;  %v574_v62 = vpack.c.bf16 %v263_v61, %v262_v60  ;;  %v357_v3 = vld [vmem:[%s821_s4] ss:$0 sm:$0xff]  ;;  %v267_v9 = vld [vmem:[#allocation6 + $0x58] sm:$0xff]  ;;  %v269_v12 = vld [vmem:[#allocation6 + $0x68] sm:$0xff] }
  0x45   :  { %527 = vmatpush3.bf16.msra.mxu0 %v526_v21  ;;  %v580_v10 = vpack.c.bf16 %v267_v9, %v266_v8  ;;  %v268_v11 = vld [vmem:[#allocation6 + $0x60] sm:$0xff]  ;;  %v270_v14 = vld [vmem:[#allocation6 + $0x70] sm:$0xff]  ;;  %v271_v15 = vld [vmem:[#allocation6 + $0x78] sm:$0xff] }
  0x46   :  { %528 = vmatprep.subr.bf16.mxu0 %v677_v0  ;;  %v583_v13 = vpack.c.bf16 %v269_v12, %v268_v11  ;;  %v586_v16 = vpack.c.bf16 %v271_v15, %v270_v14  ;;  %v358_v17 = vld [vmem:[%s822_s5] ss:$0 sm:$0xff] }
  0x47   :  { %551 = vmatpush3.bf16.msra.mxu1 %v550_v30  ;;  %v359_v22 = vld [vmem:[%s823_s6] ss:$0 sm:$0xff] }
  0x48   :  { %552 = vmatprep.subr.bf16.mxu1 %v677_v0 }
  0x49   :  { %530 = vmatpush3.bf16.msra.mxu0 %v529_v27 }
  0x4a   :  { %531 = vmatprep.subr.bf16.mxu0 %v677_v0 }
  0x4b   :  { %554 = vmatpush3.bf16.msra.mxu1 %v553_v36 }
  0x4c   :  { %555 = vmatprep.subr.bf16.mxu1 %v677_v0 }
  0x4d   :  { %533 = vmatpush3.bf16.msra.mxu0 %v532_v33 }
  0x4e   :  { %534 = vmatprep.subr.bf16.mxu0 %v677_v0 }
  0x4f   :  { %557 = vmatpush3.bf16.msra.mxu1 %v556_v44 }
  0x50   :  { %558 = vmatprep.subr.bf16.mxu1 %v677_v0 }
  0x51   :  { %536 = vmatpush3.bf16.msra.mxu0 %v535_v37 }
  0x52   :  { %537 = vmatprep.subr.bf16.mxu0 %v677_v0 }
  0x53   :  { %560 = vmatpush3.bf16.msra.mxu1 %v559_v47 }
  0x54   :  { %561 = vmatprep.subr.bf16.mxu1 %v677_v0 }
  0x55   :  { %539 = vmatpush3.bf16.msra.mxu0 %v538_v40 }
  0x56   :  { %564 = vmatprep.subr.bf16.mxu0 %v677_v0 }
  0x57   :  { %563 = vmatpush3.bf16.msra.mxu1 %v562_v50 }
  0x58   :  { %444 = vmatmul.mubr.f32.vlgmr.msra.gmra.mrb[0].mxu0 %v67_v41 }
  0x59   :  { %513 = vmatprep.mubr.msk.f32.mxu0 %vm678_vm0, %v679_v1  ;;  %566 = vmatpush3.bf16.msra.mxu0 %v565_v54  ;;  %v265_v1 = vld [vmem:[#allocation6 + $0x48] sm:$0xff] }
  0x5a   :  { %567 = vmatprep.subr.bf16.mxu0 %v677_v0  ;;  %v577_v2 = vpack.c.bf16 %v265_v1, %v264_v63 }
  0x5d   :  { %569 = vmatpush3.bf16.msra.mxu0 %v568_v56 }
  0x5e   :  { %570 = vmatprep.subr.bf16.mxu0 %v677_v0 }
  0x61   :  { %572 = vmatpush3.bf16.msra.mxu0 %v571_v59 }
  0x62   :  { %573 = vmatprep.subr.bf16.mxu0 %v677_v0 }
  0x65   :  { %575 = vmatpush3.bf16.msra.mxu0 %v574_v62 }
  0x66   :  { %576 = vmatprep.subr.bf16.mxu0 %v677_v0 }
  0x69   :  { %578 = vmatpush3.bf16.msra.mxu0 %v577_v2 }
  0x6a   :  { %579 = vmatprep.subr.bf16.mxu0 %v677_v0 }
  0x6d   :  { %581 = vmatpush3.bf16.msra.mxu0 %v580_v10 }
  0x6e   :  { %582 = vmatprep.subr.bf16.mxu0 %v677_v0 }
  0x71   :  { %584 = vmatpush3.bf16.msra.mxu0 %v583_v13 }
  0x72   :  { %585 = vmatprep.subr.bf16.mxu0 %v677_v0 }
  0x75   :  { %587 = vmatpush3.bf16.msra.mxu0 %v586_v16 }
 0x12b   :  { %v157_v4 = vpop.f32.mrb[0].mxu0 }
 0x12c   :  { %v158_v5 = vadd.f32 %v357_v3, %v157_v4  ;;  %v445_v6 = vpop.f32.mrb[1].mxu0 }
 0x12e   :  { %596 = vtanh.f32 %v158_v5 }
 0x138   :  { %v597_v7 = vpop.eup %596 }
 0x139   :  { %479 = vmatmul.mubr.f32.vlgmr.msra.gmra.mrb[0].mxu1 %v597_v7 }
 0x20c   :  { %v251_v18 = vpop.f32.mrb[0].mxu1 }
 0x20d   :  { %v252_v19 = vadd.f32 %v358_v17, %v251_v18  ;;  %v480_v20 = vpop.f32.mrb[1].mxu1 }
 0x20f   :  { %598 = vtanh.f32 %v252_v19 }
 0x219   :  { %v599_v21 = vpop.eup %598 }
 0x21a   :  { %514 = vmatmul.mubr.f32.vlgmr.msra.gmra.mrb[2].mxu0 %v599_v21 }
 0x2ed   :  { %v345_v23 = vpop.f32.mrb[2].mxu0 }
 0x2ee   :  { %v346_v24 = vadd.f32 %v359_v22, %v345_v23  ;;  %v515_v25 = vpop.f32.mrb[3].mxu0 }
 0x2f0   :  { %600 = vtanh.f32 %v346_v24 }
 0x2fa   :  { %v601_v0 = vpop.eup %600 }
 0x2fb   :  { %350 = vst [vmem:[%s824_s7] sm:$0xff] %v601_v0 }
 0x2fc   :  { %355 = vsyncpa [#allocation3], 1 }
 0x2fd   :  { %356 = vsyncpa [#allocation5], 1 }

</bundles_post_ra>
